<compile_context>
chip_gen: v6e
topology: v6e:2x2x1
jax: 0.10.0
libtpu: 0.0.40
codegen_flags: <defaults>
</compile_context>

<pallas_src>
import functools

import jax
import jax.numpy as jnp
from jax.experimental import pallas as pl
from jax.experimental.pallas import tpu as pltpu


def _linear_kernel(x_ref, wt_ref, b_ref, o_ref):
    # x_ref : (TILE_B, K)  streamed batch tile (double-buffered by Pallas)
    # wt_ref: (K, N)       VMEM-resident pre-transposed weight
    # b_ref : (1, N)       VMEM-resident bias
    y = jnp.dot(x_ref[...], wt_ref[...], preferred_element_type=jnp.float32)
    o_ref[...] = (y + b_ref[...]).astype(o_ref.dtype)


@functools.partial(jax.jit, static_argnames=("tile_b",))
def linear_classifier(x, weight, bias, *, tile_b=4096):
    """Forward pass of LinearClassifier: y = x @ weight.T + bias."""
    B, K = x.shape
    N, K2 = weight.shape
    assert K == K2, "weight in_features must match x"

    # Layout plumbing (fused into the jitted program, done once per call):
    # pre-transpose weight to (K, N) so the kernel does a plain x @ w_t.
    w_t = weight.T
    b_2d = bias.reshape(1, N)

    # Tile selection:
    #  * B <= tile_b : one block covering the whole batch; block dim == full
    #    array dim, so no 8-sublane divisibility requirement and no padding.
    #  * B  > tile_b : tile_b rows per grid step (kept a multiple of 8).
    #    grid = cdiv(B, tile_b); the ragged last block is masked by Pallas on
    #    writeback, so no wrapper-side zero-pad copy of x and no output slice.
    #    This also guarantees >= 2 grid steps, keeping both v7x TensorCores
    #    busy via the "parallel" batch axis.
    if B <= tile_b:
        tile_b = B
    else:
        tile_b = max(8, (tile_b // 8) * 8)
    grid = (pl.cdiv(B, tile_b),)

    return pl.pallas_call(
        _linear_kernel,
        out_shape=jax.ShapeDtypeStruct((B, N), x.dtype),
        grid_spec=pltpu.PrefetchScalarGridSpec(
            num_scalar_prefetch=0,
            grid=grid,
            in_specs=[
                # x: streamed per batch tile (pipelined / double-buffered).
                pl.BlockSpec((tile_b, K), lambda i: (i, 0)),
                # weight / bias: constant block index -> fetched once,
                # VMEM-resident across the whole grid.
                pl.BlockSpec((K, N), lambda i: (0, 0)),
                pl.BlockSpec((1, N), lambda i: (0, 0)),
            ],
            # Unpadded (tile_b, N) output: last block dim == full array dim,
            # so this is legal and writes only the useful 10 columns.
            out_specs=pl.BlockSpec((tile_b, N), lambda i: (i, 0)),
        ),
        compiler_params=pltpu.CompilerParams(
            # Independent batch tiles -> shard across TensorCores on v7x;
            # harmless on single-TC v5e/v6e.
            dimension_semantics=("parallel",),
        ),
    )(x, w_t, b_2d)


if __name__ == "__main__":
    # Deterministic parameters / inputs (synthetic, no checkpoint load).
    in_features = 32
    out_features = 10
    batch = 8

    key = jax.random.PRNGKey(0)
    kx, kw, kb = jax.random.split(key, 3)

    x = jax.random.normal(kx, (batch, in_features), dtype=jnp.float32)
    # Mimic nn.Linear default init scale (uniform in +-1/sqrt(in_features)).
    limit = 1.0 / (in_features ** 0.5)
    weight = jax.random.uniform(
        kw, (out_features, in_features), dtype=jnp.float32,
        minval=-limit, maxval=limit)
    bias = jax.random.uniform(
        kb, (out_features,), dtype=jnp.float32, minval=-limit, maxval=limit)

    y = linear_classifier(x, weight, bias)
    y = jax.block_until_ready(y)

    # Sanity check against plain-JAX reference.
    y_ref = x @ weight.T + bias
    assert y.shape == (batch, out_features)
    assert jnp.allclose(y, y_ref, atol=1e-5, rtol=1e-5)

    print("KERNEL_OK")
</pallas_src>

<mosaic_0001>
module attributes {stable_mosaic.version = 11 : i64} {
  func.func @_linear_kernel(%arg0: i32, %arg1: memref<8x32xf32, #tpu.memory_space<vmem>>, %arg2: memref<32x10xf32, #tpu.memory_space<vmem>>, %arg3: memref<1x10xf32, #tpu.memory_space<vmem>>, %arg4: memref<8x10xf32, #tpu.memory_space<vmem>>) attributes {dimension_semantics = [#tpu.dimension_semantics<parallel>], iteration_bounds = array<i64: 1>, scalar_prefetch = 0 : i64, scratch_operands = 0 : i64, tpu.core_type = #tpu.core_type<tc>, window_params = [{transform_indices = @transform_0, window_bounds = array<i64: 8, 32>}, {pipeline_mode = #tpu.pipeline_mode<synchronous>, transform_indices = @transform_1, window_bounds = array<i64: 32, 10>}, {pipeline_mode = #tpu.pipeline_mode<synchronous>, transform_indices = @transform_2, window_bounds = array<i64: 1, 10>}, {transform_indices = @transform_3, window_bounds = array<i64: 8, 10>}]} {
    %c0 = arith.constant 0 : index
    %c0_0 = arith.constant 0 : index
    %0 = vector.load %arg1[%c0, %c0_0] : memref<8x32xf32, #tpu.memory_space<vmem>>, vector<8x32xf32>
    %c0_1 = arith.constant 0 : index
    %c0_2 = arith.constant 0 : index
    %1 = vector.load %arg2[%c0_1, %c0_2] : memref<32x10xf32, #tpu.memory_space<vmem>>, vector<32x10xf32>
    %cst = arith.constant dense<0.000000e+00> : vector<8x10xf32>
    %2 = tpu.matmul %0, %1, %cst {dimension_numbers = #tpu.dot_dimension_numbers<[1], [0], [0], [1], [0, 0, 1, 1], [], []>} : vector<8x32xf32>, vector<32x10xf32>, vector<8x10xf32> -> vector<8x10xf32>
    %c0_3 = arith.constant 0 : index
    %c0_4 = arith.constant 0 : index
    %3 = vector.load %arg3[%c0_3, %c0_4] : memref<1x10xf32, #tpu.memory_space<vmem>>, vector<1x10xf32>
    %4 = vector.broadcast %3 : vector<1x10xf32> to vector<8x10xf32>
    %5 = arith.addf %2, %4 : vector<8x10xf32>
    %c0_5 = arith.constant 0 : index
    %c0_6 = arith.constant 0 : index
    %6 = vector.load %arg4[%c0_5, %c0_6] : memref<8x10xf32, #tpu.memory_space<vmem>>, vector<8x10xf32>
    tpu.vector_store %arg4[%c0_5, %c0_6], %5 {strides = array<i32>} : memref<8x10xf32, #tpu.memory_space<vmem>>, vector<8x10xf32>,
    return
  }
  func.func @transform_0(%arg0: i32) -> (i32, i32) {
    %c0_i32 = arith.constant 0 : i32
    %c0_i32_0 = arith.constant 0 : i32
    return %arg0, %c0_i32 : i32, i32
  }
  func.func @transform_1(%arg0: i32) -> (i32, i32) {
    %c0_i32 = arith.constant 0 : i32
    %c0_i32_0 = arith.constant 0 : i32
    %c0_i32_1 = arith.constant 0 : i32
    return %c0_i32, %c0_i32_0 : i32, i32
  }
  func.func @transform_2(%arg0: i32) -> (i32, i32) {
    %c0_i32 = arith.constant 0 : i32
    %c0_i32_0 = arith.constant 0 : i32
    %c0_i32_1 = arith.constant 0 : i32
    return %c0_i32, %c0_i32_0 : i32, i32
  }
  func.func @transform_3(%arg0: i32) -> (i32, i32) {
    %c0_i32 = arith.constant 0 : i32
    %c0_i32_0 = arith.constant 0 : i32
    return %arg0, %c0_i32 : i32, i32
  }
}

</mosaic_0001>

<bundles_post_ra>
// kernel: linear_classifier.1
= control target key start
LH: loop header
LB: loop body
LE: loop exit
PB: predicated region body
PF: predicated region fallthrough
CT: control target
= control target key end

     0   :  { %v160_v1 = vmov 0.0   ;;  %vm161_vm0 = vmmov 0   ;;  %s204_s0 = inlined_call_operand.vmem [shape: f32[8,32], index: 0, kind: input, shape index: {}]   ;;  %s205_s1 = inlined_call_operand.vmem [shape: f32[32,10], index: 1, kind: input, shape index: {}]   ;;  %s206_s2 = inlined_call_operand.vmem [shape: f32[1,10], index: 2, kind: input, shape index: {}]   ;;  %s207_s3 = inlined_call_operand.hbm [shape: f32[8,10], index: 3, kind: output, shape index: {}]  }
   0x1   :  { %v19_v0 = vld [vmem:[%s205_s1 + $0x18] sm:$0xff]  ;;  %124 = vmatprep.subr.mxu0 %v160_v1  ;;  %v18_v2 = vld [vmem:[%s205_s1 + $0x10] sm:$0xff]  ;;  %132 = vmatprep.mubr.msk.f32.mxu0 %vm161_vm0, %v160_v1 }
   0x2   :  { %125 = vmatpush3.msra.mxu0 %v19_v0 }
   0x3   :  { %8 = vsyncpa [#allocation3], 0  ;;  %126 = vmatprep.subr.mxu0 %v160_v1  ;;  %v17_v3 = vld [vmem:[%s205_s1 + $0x8] sm:$0xff]  ;;  %v16_v4 = vld [vmem:[%s205_s1] sm:$0xff]  ;;  %vm27_vm1 = vcmask 261120   ;;  %s162_s24 = smov [#allocation2]  }
   0x4   :  { %127 = vmatpush3.msra.mxu0 %v18_v2  ;;  %v15_v5 = vld [vmem:[%s204_s0] sm:$0xff]  ;;  %s109_s25 = sshll.u32 %s162_s24, 4  ;;  %vm101_vm2 = vcmask 80896   ;;  %s110_s25 = int_to_ptr.vmem [resolvable:$true] %s109_s25 }
   0x5   :  { %128 = vmatprep.subr.mxu0 %v160_v1  ;;  %v117_v6 = vld [vmem:[%s206_s2] ss:$0 sm:$0xff]  ;;  %s138_s1 = scalar_lea.vmem %s110_s25, 128  ;;  %p143_p1 = scmp.lt.s32.totalorder %s110_s25, %s110_s25 }
   0x6   :  { %129 = vmatpush3.msra.mxu0 %v17_v3  ;;  %p139_p0 = scmp.ne.s32.totalorder %s110_s25, %s138_s1  ;;  %p144_p2 = scmp.lt.s32.totalorder %s138_s1, %s138_s1 }
   0x7   :  { %130 = vmatprep.subr.mxu0 %v160_v1 }
   0x8   :  { %131 = vmatpush3.msra.mxu0 %v16_v4  ;;  %p145_p3 = por %p144_p2, %p143_p1 }
   0x9   :  { %133 = vmatmul.mubr.msk.f32.vlgmr.msra.gmra.mxu0 %vm27_vm1, %v15_v5 }
   0xa   :  { %p146_p4 = pnand %p145_p3, %p139_p0 }
  0xc9   :  { %v97_v7 = vpop.f32.mrf.mxu0 }
  0xca   :  { %v98_v8 = vadd.f32 %v117_v6, %v97_v7 }
  0xcb   :  { %v134_v9 = vpop.f32.mrf.mxu0 }
  0xcc   :  { %102 = vst.msk [vmem:[#allocation2] sm:$0xff] %vm101_vm2, %v98_v8 }
  0xcd   :  { %149 = shalt.err (!%p146_p4)
}
  0xce   :  { %112 = dma.vmem_to_hbm [thread:$0]  %s110_s25, 128, %s207_s3, [#allocation3]  }
  0xcf   :  { %158 = dma.done.wait [#allocation3], 128  }
  0xd0   :  { %159 = vsyncadd [#allocation3], 4294967168 }
  0xd1   :  { %116 = vsyncpa [#allocation3], 1 }

</bundles_post_ra>
